<compile_context>
chip_gen: v5e
topology: v5e:2x2
jax: 0.10.0
libtpu: 0.0.40
codegen_flags: <defaults>
</compile_context>

<pallas_src>
import functools

import jax
import jax.numpy as jnp
from jax import lax
from jax.experimental import pallas as pl
from jax.experimental.pallas import tpu as pltpu


_LANE = 128
_BLOCK_BUDGET_BYTES = 4 * 1024 * 1024   # per input block (Pallas double-buffers it)


def _vmem_limit_bytes():
    """Generation-aware scoped-VMEM limit with a safe fallback."""
    try:
        phys = int(pltpu.get_tpu_info().vmem_capacity_bytes)
        return int(max(min(phys * 3 // 4, 96 * 1024 * 1024), 32 * 1024 * 1024))
    except Exception:
        return 32 * 1024 * 1024


def _compiler_params(semantics):
    return pltpu.CompilerParams(
        dimension_semantics=semantics,
        vmem_limit_bytes=_vmem_limit_bytes(),
    )


# ----------------------------------------------------------------------------
# Pass 1: entropy of softmax over the last axis of `a`.
# ----------------------------------------------------------------------------

def _entropy_rows_kernel(x_ref, o_ref, *, seg, pack, row_tile, n_rows):
    """Per-tile partial of -sum(p * log p) with softmax over `seg`-wide lane segments.

    x block: (row_tile, pack*seg); each lane-row packs `pack` logical rows.
    Writes a (1, 1, 128) lane-broadcast scalar partial for this tile.
    """
    ent = jnp.zeros((row_tile, 1), jnp.float32)
    for s in range(pack):                                   # static unroll
        xs = x_ref[:, s * seg:(s + 1) * seg].astype(jnp.float32)
        xm = jnp.max(xs, axis=-1, keepdims=True)
        xc = xs - xm
        ex = jnp.exp(xc)
        se = jnp.sum(ex, axis=-1, keepdims=True)            # sum exp
        we = jnp.sum(ex * xc, axis=-1, keepdims=True)       # sum exp*(x-max)
        ent = ent + (jnp.log(se) - we / se)                 # per-row entropy
    if n_rows % row_tile != 0:                              # static: tail tile exists
        rid = pl.program_id(0) * row_tile + lax.broadcasted_iota(
            jnp.int32, (row_tile, 1), 0)
        ent = jnp.where(rid < n_rows, ent, 0.0)
    o_ref[...] = jnp.full((1, 1, _LANE), jnp.sum(ent), jnp.float32)


def _entropy_last_axis(a):
    """-sum(softmax*log_softmax) over the last axis of `a`, summed to a scalar."""
    *lead, K = a.shape
    rows = 1
    for d in lead:
        rows *= d
    if rows == 0 or K == 0:
        return jnp.float32(0.0)

    pack = 1
    if K <= _LANE and _LANE % K == 0 and rows % (_LANE // K) == 0:
        pack = _LANE // K               # e.g. K=32 -> 4 logical rows per vreg row
    # TODO(synk): when rows % (128 // K) != 0, pad rows (and subtract
    # n_pad * log(K)) so lane-dense packing is kept for awkward row counts.
    R = rows // pack
    L = pack * K
    a2d = a.reshape(R, L)               # pure row-major reshape (free)

    itemsize = a2d.dtype.itemsize
    row_bytes = L * itemsize
    if R * row_bytes <= _BLOCK_BUDGET_BYTES:
        row_tile = R
    else:
        row_tile = max((_BLOCK_BUDGET_BYTES // row_bytes) // 8 * 8, 8)
        # TODO(synk): for K so large that even 8 rows blow VMEM, add a K grid
        # axis with flash-style online (max, sum-exp, sum-x*exp) accumulation.
    n_tiles = pl.cdiv(R, row_tile)

    n = a.size
    cost = pl.CostEstimate(
        flops=int(6 * n),
        transcendentals=int(n + rows),
        bytes_accessed=int(n * itemsize + n_tiles * _LANE * 4),
    )
    out = pl.pallas_call(
        functools.partial(_entropy_rows_kernel, seg=K, pack=pack,
                          row_tile=row_tile, n_rows=R),
        out_shape=jax.ShapeDtypeStruct((n_tiles, 1, _LANE), jnp.float32),
        grid=(n_tiles,),
        in_specs=[pl.BlockSpec((row_tile, L), lambda i: (i, 0))],
        out_specs=pl.BlockSpec((1, 1, _LANE), lambda i: (i, 0, 0)),
        compiler_params=_compiler_params(("parallel",)),
        cost_estimate=cost,
    )(a2d)
    return jnp.sum(out[:, 0, 0])


# ----------------------------------------------------------------------------
# Pass 2: entropy of softmax over dim=1 (channels) of NCHW `m`.
# ----------------------------------------------------------------------------

def _entropy_channel_kernel4(x_ref, o_ref, *, C, b_tile, sub_tile, n_b, n_sub):
    """Channel-softmax entropy; block (b_tile, C, sub_tile, 128) — dense last 2 dims.

    Writes per-lane partial sums (1, 1, 128) for this tile.
    """
    xm = x_ref[:, 0, :, :].astype(jnp.float32)
    for c in range(1, C):
        xm = jnp.maximum(xm, x_ref[:, c, :, :].astype(jnp.float32))
    se = jnp.zeros(xm.shape, jnp.float32)
    we = jnp.zeros(xm.shape, jnp.float32)
    for c in range(C):
        xc = x_ref[:, c, :, :].astype(jnp.float32) - xm
        ex = jnp.exp(xc)
        se = se + ex
        we = we + ex * xc
    ent = jnp.log(se) - we / se                     # (b_tile, sub_tile, 128)
    if n_b % b_tile != 0:                           # static tail checks
        bid = pl.program_id(0) * b_tile + lax.broadcasted_iota(
            jnp.int32, (b_tile, 1, 1), 0)
        ent = jnp.where(bid < n_b, ent, 0.0)
    if n_sub % sub_tile != 0:
        sid = pl.program_id(1) * sub_tile + lax.broadcasted_iota(
            jnp.int32, (1, sub_tile, 1), 1)
        ent = jnp.where(sid < n_sub, ent, 0.0)
    o_ref[...] = jnp.sum(ent, axis=(0, 1)).reshape(1, 1, _LANE)


def _entropy_channel_kernel3(x_ref, o_ref, *, C, b_tile, lane_tile, n_b, n_hw):
    """Fallback (HW % 128 != 0): block (b_tile, C, lane_tile), C on sublanes."""
    xm = x_ref[:, 0, :].astype(jnp.float32)
    for c in range(1, C):
        xm = jnp.maximum(xm, x_ref[:, c, :].astype(jnp.float32))
    se = jnp.zeros(xm.shape, jnp.float32)
    we = jnp.zeros(xm.shape, jnp.float32)
    for c in range(C):
        xc = x_ref[:, c, :].astype(jnp.float32) - xm
        ex = jnp.exp(xc)
        se = se + ex
        we = we + ex * xc
    ent = jnp.log(se) - we / se                     # (b_tile, lane_tile)
    if n_b % b_tile != 0:
        bid = pl.program_id(0) * b_tile + lax.broadcasted_iota(
            jnp.int32, (b_tile, 1), 0)
        ent = jnp.where(bid < n_b, ent, 0.0)
    if n_hw % lane_tile != 0:
        lid = pl.program_id(1) * lane_tile + lax.broadcasted_iota(
            jnp.int32, (1, lane_tile), 1)
        ent = jnp.where(lid < n_hw, ent, 0.0)
    o_ref[...] = jnp.full((1, 1, _LANE), jnp.sum(ent), jnp.float32)


def _entropy_channel(m):
    """-sum(softmax*log_softmax) over dim=1 of NCHW `m`, summed to a scalar."""
    B, C, H, W = m.shape
    HW = H * W
    if B == 0 or C == 0 or HW == 0:
        return jnp.float32(0.0)
    itemsize = m.dtype.itemsize
    n = m.size
    per_b_bytes = C * HW * itemsize

    if HW % _LANE == 0:
        # Dense path: last two block dims are (sub_tile, 128), full occupancy.
        n_sub = HW // _LANE
        m4 = m.reshape(B, C, n_sub, _LANE)          # pure reshape (free)
        if per_b_bytes <= _BLOCK_BUDGET_BYTES:
            sub_tile = n_sub
            b_tile = min(B, max(1, _BLOCK_BUDGET_BYTES // per_b_bytes))
        else:
            b_tile = 1
            sub_tile = max((_BLOCK_BUDGET_BYTES // (C * _LANE * itemsize)) // 8 * 8, 8)
            sub_tile = min(sub_tile, n_sub)
        gb = pl.cdiv(B, b_tile)
        gs = pl.cdiv(n_sub, sub_tile)
        cost = pl.CostEstimate(
            flops=int(7 * n), transcendentals=int(n + B * HW),
            bytes_accessed=int(n * itemsize + gb * gs * _LANE * 4))
        out = pl.pallas_call(
            functools.partial(_entropy_channel_kernel4, C=C, b_tile=b_tile,
                              sub_tile=sub_tile, n_b=B, n_sub=n_sub),
            out_shape=jax.ShapeDtypeStruct((gb * gs, 1, _LANE), jnp.float32),
            grid=(gb, gs),
            in_specs=[pl.BlockSpec((b_tile, C, sub_tile, _LANE),
                                   lambda i, j: (i, 0, j, 0))],
            out_specs=pl.BlockSpec((1, 1, _LANE),
                                   lambda i, j: (i * gs + j, 0, 0)),
            compiler_params=_compiler_params(("parallel", "parallel")),
            cost_estimate=cost,
        )(m4)
        return jnp.sum(out)

    # Fallback path: HW not a multiple of 128 (half-occupied sublanes when C<8).
    m3 = m.reshape(B, C, HW)
    if per_b_bytes <= _BLOCK_BUDGET_BYTES:
        lane_tile = HW
        b_tile = min(B, max(1, _BLOCK_BUDGET_BYTES // per_b_bytes))
    else:
        b_tile = 1
        lane_tile = max((_BLOCK_BUDGET_BYTES // (C * itemsize)) // _LANE * _LANE, _LANE)
    gb = pl.cdiv(B, b_tile)
    gl = pl.cdiv(HW, lane_tile)
    cost = pl.CostEstimate(
        flops=int(7 * n), transcendentals=int(n + B * HW),
        bytes_accessed=int(n * itemsize + gb * gl * _LANE * 4))
    out = pl.pallas_call(
        functools.partial(_entropy_channel_kernel3, C=C, b_tile=b_tile,
                          lane_tile=lane_tile, n_b=B, n_hw=HW),
        out_shape=jax.ShapeDtypeStruct((gb * gl, 1, _LANE), jnp.float32),
        grid=(gb, gl),
        in_specs=[pl.BlockSpec((b_tile, C, lane_tile),
                               lambda i, j: (i, 0, j))],
        out_specs=pl.BlockSpec((1, 1, _LANE),
                               lambda i, j: (i * gl + j, 0, 0)),
        compiler_params=_compiler_params(("parallel", "parallel")),
        cost_estimate=cost,
    )(m3)
    return jnp.sum(out[:, 0, 0])


# ----------------------------------------------------------------------------
# Public API + reference
# ----------------------------------------------------------------------------

def entropy_loss(a, m):
    """a: [..., K] (softmax over last axis), m: [B, C, H, W] (softmax over C)."""
    return _entropy_last_axis(a) + _entropy_channel(m)


def entropy_loss_ref(a, m):
    """Pure-JAX reference mirroring the PyTorch module."""
    la = jax.nn.log_softmax(a, axis=-1)
    sa = jax.nn.softmax(a, axis=-1)
    lm = jax.nn.log_softmax(m, axis=1)
    sm = jax.nn.softmax(m, axis=1)
    return -(sa * la).sum() + -(sm * lm).sum()


if __name__ == "__main__":
    key = jax.random.PRNGKey(0)
    k1, k2 = jax.random.split(key)
    # a: [batch=2, seq=8, hidden=32];  m: NCHW [batch=2, channels=4, 16, 16]
    a = jax.random.normal(k1, (2, 8, 32), dtype=jnp.float32)
    m = jax.random.normal(k2, (2, 4, 16, 16), dtype=jnp.float32)

    loss_fn = jax.jit(entropy_loss)
    out = jax.block_until_ready(loss_fn(a, m))
    ref = jax.block_until_ready(entropy_loss_ref(a, m))
    assert jnp.allclose(out, ref, rtol=1e-5, atol=1e-4), (out, ref)
    print("KERNEL_OK")
</pallas_src>

<mosaic_0001>
module attributes {stable_mosaic.version = 11 : i64} {
  func.func @_entropy_channel_kernel4(%arg0: i32, %arg1: i32, %arg2: memref<2x4x2x128xf32, #tpu.memory_space<vmem>>, %arg3: memref<1x1x128xf32, #tpu.memory_space<vmem>>) attributes {dimension_semantics = [#tpu.dimension_semantics<parallel>, #tpu.dimension_semantics<parallel>], iteration_bounds = array<i64: 1, 1>, scalar_prefetch = 0 : i64, scratch_operands = 0 : i64, tpu.core_type = #tpu.core_type<tc>, window_params = [{transform_indices = @transform_0, window_bounds = array<i64: 2, 4, 2, 128>}, {transform_indices = @transform_1, window_bounds = array<i64: 1, 1, 128>}]} {
    %c0 = arith.constant 0 : index
    %c0_0 = arith.constant 0 : index
    %c0_1 = arith.constant 0 : index
    %c0_2 = arith.constant 0 : index
    %0 = vector.load %arg2[%c0, %c0_0, %c0_1, %c0_2] : memref<2x4x2x128xf32, #tpu.memory_space<vmem>>, vector<2x1x2x128xf32>
    %1 = vector.shape_cast %0 : vector<2x1x2x128xf32> to vector<2x2x128xf32>
    %c0_3 = arith.constant 0 : index
    %c1 = arith.constant 1 : index
    %c0_4 = arith.constant 0 : index
    %c0_5 = arith.constant 0 : index
    %2 = vector.load %arg2[%c0_3, %c1, %c0_4, %c0_5] : memref<2x4x2x128xf32, #tpu.memory_space<vmem>>, vector<2x1x2x128xf32>
    %3 = vector.shape_cast %2 : vector<2x1x2x128xf32> to vector<2x2x128xf32>
    %4 = arith.maximumf %1, %3 : vector<2x2x128xf32>
    %c0_6 = arith.constant 0 : index
    %c2 = arith.constant 2 : index
    %c0_7 = arith.constant 0 : index
    %c0_8 = arith.constant 0 : index
    %5 = vector.load %arg2[%c0_6, %c2, %c0_7, %c0_8] : memref<2x4x2x128xf32, #tpu.memory_space<vmem>>, vector<2x1x2x128xf32>
    %6 = vector.shape_cast %5 : vector<2x1x2x128xf32> to vector<2x2x128xf32>
    %7 = arith.maximumf %4, %6 : vector<2x2x128xf32>
    %c0_9 = arith.constant 0 : index
    %c3 = arith.constant 3 : index
    %c0_10 = arith.constant 0 : index
    %c0_11 = arith.constant 0 : index
    %8 = vector.load %arg2[%c0_9, %c3, %c0_10, %c0_11] : memref<2x4x2x128xf32, #tpu.memory_space<vmem>>, vector<2x1x2x128xf32>
    %9 = vector.shape_cast %8 : vector<2x1x2x128xf32> to vector<2x2x128xf32>
    %10 = arith.maximumf %7, %9 : vector<2x2x128xf32>
    %cst = arith.constant 0.000000e+00 : f32
    %11 = vector.broadcast %cst : f32 to vector<2x2x128xf32>
    %cst_12 = arith.constant 0.000000e+00 : f32
    %12 = vector.broadcast %cst_12 : f32 to vector<2x2x128xf32>
    %c0_13 = arith.constant 0 : index
    %c0_14 = arith.constant 0 : index
    %c0_15 = arith.constant 0 : index
    %c0_16 = arith.constant 0 : index
    %13 = vector.load %arg2[%c0_13, %c0_14, %c0_15, %c0_16] : memref<2x4x2x128xf32, #tpu.memory_space<vmem>>, vector<2x1x2x128xf32>
    %14 = vector.shape_cast %13 : vector<2x1x2x128xf32> to vector<2x2x128xf32>
    %15 = arith.subf %14, %10 : vector<2x2x128xf32>
    %16 = math.exp %15 : vector<2x2x128xf32>
    %17 = arith.addf %11, %16 : vector<2x2x128xf32>
    %18 = arith.mulf %16, %15 : vector<2x2x128xf32>
    %19 = arith.addf %12, %18 : vector<2x2x128xf32>
    %c0_17 = arith.constant 0 : index
    %c1_18 = arith.constant 1 : index
    %c0_19 = arith.constant 0 : index
    %c0_20 = arith.constant 0 : index
    %20 = vector.load %arg2[%c0_17, %c1_18, %c0_19, %c0_20] : memref<2x4x2x128xf32, #tpu.memory_space<vmem>>, vector<2x1x2x128xf32>
    %21 = vector.shape_cast %20 : vector<2x1x2x128xf32> to vector<2x2x128xf32>
    %22 = arith.subf %21, %10 : vector<2x2x128xf32>
    %23 = math.exp %22 : vector<2x2x128xf32>
    %24 = arith.addf %17, %23 : vector<2x2x128xf32>
    %25 = arith.mulf %23, %22 : vector<2x2x128xf32>
    %26 = arith.addf %19, %25 : vector<2x2x128xf32>
    %c0_21 = arith.constant 0 : index
    %c2_22 = arith.constant 2 : index
    %c0_23 = arith.constant 0 : index
    %c0_24 = arith.constant 0 : index
    %27 = vector.load %arg2[%c0_21, %c2_22, %c0_23, %c0_24] : memref<2x4x2x128xf32, #tpu.memory_space<vmem>>, vector<2x1x2x128xf32>
    %28 = vector.shape_cast %27 : vector<2x1x2x128xf32> to vector<2x2x128xf32>
    %29 = arith.subf %28, %10 : vector<2x2x128xf32>
    %30 = math.exp %29 : vector<2x2x128xf32>
    %31 = arith.addf %24, %30 : vector<2x2x128xf32>
    %32 = arith.mulf %30, %29 : vector<2x2x128xf32>
    %33 = arith.addf %26, %32 : vector<2x2x128xf32>
    %c0_25 = arith.constant 0 : index
    %c3_26 = arith.constant 3 : index
    %c0_27 = arith.constant 0 : index
    %c0_28 = arith.constant 0 : index
    %34 = vector.load %arg2[%c0_25, %c3_26, %c0_27, %c0_28] : memref<2x4x2x128xf32, #tpu.memory_space<vmem>>, vector<2x1x2x128xf32>
    %35 = vector.shape_cast %34 : vector<2x1x2x128xf32> to vector<2x2x128xf32>
    %36 = arith.subf %35, %10 : vector<2x2x128xf32>
    %37 = math.exp %36 : vector<2x2x128xf32>
    %38 = arith.addf %31, %37 : vector<2x2x128xf32>
    %39 = arith.mulf %37, %36 : vector<2x2x128xf32>
    %40 = arith.addf %33, %39 : vector<2x2x128xf32>
    %41 = math.log %38 : vector<2x2x128xf32>
    %42 = arith.divf %40, %38 : vector<2x2x128xf32>
    %43 = arith.subf %41, %42 : vector<2x2x128xf32>
    %cst_29 = arith.constant dense<0.000000e+00> : vector<128xf32>
    %44 = vector.multi_reduction <add>, %43, %cst_29 [0, 1] : vector<2x2x128xf32> to vector<128xf32>
    %45 = vector.shape_cast %44 : vector<128xf32> to vector<1x1x128xf32>
    %c0_30 = arith.constant 0 : index
    %c0_31 = arith.constant 0 : index
    %c0_32 = arith.constant 0 : index
    %46 = vector.load %arg3[%c0_30, %c0_31, %c0_32] : memref<1x1x128xf32, #tpu.memory_space<vmem>>, vector<1x1x128xf32>
    tpu.vector_store %arg3[%c0_30, %c0_31, %c0_32], %45 {strides = array<i32>} : memref<1x1x128xf32, #tpu.memory_space<vmem>>, vector<1x1x128xf32>,
    return
  }
  func.func @transform_0(%arg0: i32, %arg1: i32) -> (i32, i32, i32, i32) {
    %c0_i32 = arith.constant 0 : i32
    %c0_i32_0 = arith.constant 0 : i32
    %c0_i32_1 = arith.constant 0 : i32
    return %arg0, %c0_i32, %arg1, %c0_i32_0 : i32, i32, i32, i32
  }
  func.func @transform_1(%arg0: i32, %arg1: i32) -> (i32, i32, i32) {
    %c1_i32 = arith.constant 1 : i32
    %0 = arith.muli %arg0, %c1_i32 : i32
    %1 = arith.addi %0, %arg1 : i32
    %c0_i32 = arith.constant 0 : i32
    %c0_i32_0 = arith.constant 0 : i32
    %c0_i32_1 = arith.constant 0 : i32
    return %1, %c0_i32, %c0_i32_0 : i32, i32, i32
  }
}

module attributes {stable_mosaic.version = 11 : i64} {
  func.func @_entropy_rows_kernel(%arg0: i32, %arg1: memref<4x128xf32, #tpu.memory_space<vmem>>, %arg2: memref<1x1x128xf32, #tpu.memory_space<vmem>>) attributes {dimension_semantics = [#tpu.dimension_semantics<parallel>], iteration_bounds = array<i64: 1>, scalar_prefetch = 0 : i64, scratch_operands = 0 : i64, tpu.core_type = #tpu.core_type<tc>, window_params = [{transform_indices = @transform_0, window_bounds = array<i64: 4, 128>}, {transform_indices = @transform_1, window_bounds = array<i64: 1, 1, 128>}]} {
    %cst = arith.constant 0.000000e+00 : f32
    %0 = vector.broadcast %cst : f32 to vector<4x1xf32>
    %c0 = arith.constant 0 : index
    %c0_0 = arith.constant 0 : index
    %1 = vector.load %arg1[%c0, %c0_0] : memref<4x128xf32, #tpu.memory_space<vmem>>, vector<4x32xf32>
    %cst_1 = arith.constant dense<0xFF800000> : vector<4xf32>
    %2 = vector.multi_reduction <maximumf>, %1, %cst_1 [1] : vector<4x32xf32> to vector<4xf32>
    %3 = vector.shape_cast %2 : vector<4xf32> to vector<4x1xf32>
    %4 = vector.broadcast %3 : vector<4x1xf32> to vector<4x32xf32>
    %5 = arith.subf %1, %4 : vector<4x32xf32>
    %6 = math.exp %5 : vector<4x32xf32>
    %cst_2 = arith.constant dense<0.000000e+00> : vector<4xf32>
    %7 = vector.multi_reduction <add>, %6, %cst_2 [1] : vector<4x32xf32> to vector<4xf32>
    %8 = vector.shape_cast %7 : vector<4xf32> to vector<4x1xf32>
    %9 = arith.mulf %6, %5 : vector<4x32xf32>
    %cst_3 = arith.constant dense<0.000000e+00> : vector<4xf32>
    %10 = vector.multi_reduction <add>, %9, %cst_3 [1] : vector<4x32xf32> to vector<4xf32>
    %11 = vector.shape_cast %10 : vector<4xf32> to vector<4x1xf32>
    %12 = math.log %8 : vector<4x1xf32>
    %13 = arith.divf %11, %8 : vector<4x1xf32>
    %14 = arith.subf %12, %13 : vector<4x1xf32>
    %15 = arith.addf %0, %14 : vector<4x1xf32>
    %c0_4 = arith.constant 0 : index
    %c32 = arith.constant 32 : index
    %16 = vector.load %arg1[%c0_4, %c32] : memref<4x128xf32, #tpu.memory_space<vmem>>, vector<4x32xf32>
    %cst_5 = arith.constant dense<0xFF800000> : vector<4xf32>
    %17 = vector.multi_reduction <maximumf>, %16, %cst_5 [1] : vector<4x32xf32> to vector<4xf32>
    %18 = vector.shape_cast %17 : vector<4xf32> to vector<4x1xf32>
    %19 = vector.broadcast %18 : vector<4x1xf32> to vector<4x32xf32>
    %20 = arith.subf %16, %19 : vector<4x32xf32>
    %21 = math.exp %20 : vector<4x32xf32>
    %cst_6 = arith.constant dense<0.000000e+00> : vector<4xf32>
    %22 = vector.multi_reduction <add>, %21, %cst_6 [1] : vector<4x32xf32> to vector<4xf32>
    %23 = vector.shape_cast %22 : vector<4xf32> to vector<4x1xf32>
    %24 = arith.mulf %21, %20 : vector<4x32xf32>
    %cst_7 = arith.constant dense<0.000000e+00> : vector<4xf32>
    %25 = vector.multi_reduction <add>, %24, %cst_7 [1] : vector<4x32xf32> to vector<4xf32>
    %26 = vector.shape_cast %25 : vector<4xf32> to vector<4x1xf32>
    %27 = math.log %23 : vector<4x1xf32>
    %28 = arith.divf %26, %23 : vector<4x1xf32>
    %29 = arith.subf %27, %28 : vector<4x1xf32>
    %30 = arith.addf %15, %29 : vector<4x1xf32>
    %c0_8 = arith.constant 0 : index
    %c64 = arith.constant 64 : index
    %31 = vector.load %arg1[%c0_8, %c64] : memref<4x128xf32, #tpu.memory_space<vmem>>, vector<4x32xf32>
    %cst_9 = arith.constant dense<0xFF800000> : vector<4xf32>
    %32 = vector.multi_reduction <maximumf>, %31, %cst_9 [1] : vector<4x32xf32> to vector<4xf32>
    %33 = vector.shape_cast %32 : vector<4xf32> to vector<4x1xf32>
    %34 = vector.broadcast %33 : vector<4x1xf32> to vector<4x32xf32>
    %35 = arith.subf %31, %34 : vector<4x32xf32>
    %36 = math.exp %35 : vector<4x32xf32>
    %cst_10 = arith.constant dense<0.000000e+00> : vector<4xf32>
    %37 = vector.multi_reduction <add>, %36, %cst_10 [1] : vector<4x32xf32> to vector<4xf32>
    %38 = vector.shape_cast %37 : vector<4xf32> to vector<4x1xf32>
    %39 = arith.mulf %36, %35 : vector<4x32xf32>
    %cst_11 = arith.constant dense<0.000000e+00> : vector<4xf32>
    %40 = vector.multi_reduction <add>, %39, %cst_11 [1] : vector<4x32xf32> to vector<4xf32>
    %41 = vector.shape_cast %40 : vector<4xf32> to vector<4x1xf32>
    %42 = math.log %38 : vector<4x1xf32>
    %43 = arith.divf %41, %38 : vector<4x1xf32>
    %44 = arith.subf %42, %43 : vector<4x1xf32>
    %45 = arith.addf %30, %44 : vector<4x1xf32>
    %c0_12 = arith.constant 0 : index
    %c96 = arith.constant 96 : index
    %46 = vector.load %arg1[%c0_12, %c96] : memref<4x128xf32, #tpu.memory_space<vmem>>, vector<4x32xf32>
    %cst_13 = arith.constant dense<0xFF800000> : vector<4xf32>
    %47 = vector.multi_reduction <maximumf>, %46, %cst_13 [1] : vector<4x32xf32> to vector<4xf32>
    %48 = vector.shape_cast %47 : vector<4xf32> to vector<4x1xf32>
    %49 = vector.broadcast %48 : vector<4x1xf32> to vector<4x32xf32>
    %50 = arith.subf %46, %49 : vector<4x32xf32>
    %51 = math.exp %50 : vector<4x32xf32>
    %cst_14 = arith.constant dense<0.000000e+00> : vector<4xf32>
    %52 = vector.multi_reduction <add>, %51, %cst_14 [1] : vector<4x32xf32> to vector<4xf32>
    %53 = vector.shape_cast %52 : vector<4xf32> to vector<4x1xf32>
    %54 = arith.mulf %51, %50 : vector<4x32xf32>
    %cst_15 = arith.constant dense<0.000000e+00> : vector<4xf32>
    %55 = vector.multi_reduction <add>, %54, %cst_15 [1] : vector<4x32xf32> to vector<4xf32>
    %56 = vector.shape_cast %55 : vector<4xf32> to vector<4x1xf32>
    %57 = math.log %53 : vector<4x1xf32>
    %58 = arith.divf %56, %53 : vector<4x1xf32>
    %59 = arith.subf %57, %58 : vector<4x1xf32>
    %60 = arith.addf %45, %59 : vector<4x1xf32>
    %61 = vector.shape_cast %60 : vector<4x1xf32> to vector<1x4x1xf32>
    %cst_16 = arith.constant dense<0.000000e+00> : vector<1xf32>
    %62 = vector.multi_reduction <add>, %61, %cst_16 [1, 2] : vector<1x4x1xf32> to vector<1xf32>
    %63 = vector.shape_cast %62 : vector<1xf32> to vector<1x1x1xf32>
    %64 = vector.extract %63[0, 0, 0] : f32 from vector<1x1x1xf32>
    %65 = vector.broadcast %64 : f32 to vector<1x1x128xf32>
    %c0_17 = arith.constant 0 : index
    %c0_18 = arith.constant 0 : index
    %c0_19 = arith.constant 0 : index
    %66 = vector.load %arg2[%c0_17, %c0_18, %c0_19] : memref<1x1x128xf32, #tpu.memory_space<vmem>>, vector<1x1x128xf32>
    tpu.vector_store %arg2[%c0_17, %c0_18, %c0_19], %65 {strides = array<i32>} : memref<1x1x128xf32, #tpu.memory_space<vmem>>, vector<1x1x128xf32>,
    return
  }
  func.func @transform_0(%arg0: i32) -> (i32, i32) {
    %c0_i32 = arith.constant 0 : i32
    %c0_i32_0 = arith.constant 0 : i32
    return %arg0, %c0_i32 : i32, i32
  }
  func.func @transform_1(%arg0: i32) -> (i32, i32, i32) {
    %c0_i32 = arith.constant 0 : i32
    %c0_i32_0 = arith.constant 0 : i32
    %c0_i32_1 = arith.constant 0 : i32
    return %arg0, %c0_i32, %c0_i32_0 : i32, i32, i32
  }
}

</mosaic_0001>

<bundles_post_ra>
// kernel: entropy_loss.3
= control target key start
LH: loop header
LB: loop body
LE: loop exit
PB: predicated region body
PF: predicated region fallthrough
CT: control target
= control target key end

     0   :  { %vm118_vm8 = vcmask 1041408   ;;  %s219_s0 = inlined_call_operand.vmem [shape: f32[2,4,2,128], index: 0, kind: input, shape index: {}]   ;;  %s220_s1 = inlined_call_operand.vmem [shape: f32[1,1,128], index: 1, kind: output, shape index: {}]  }
   0x1   :  { %v17_v0 = vld [vmem:[%s219_s0] sm:$0x3]  ;;  %v18_v1 = vld [vmem:[%s219_s0 + $0x8] sm:$0x3]  ;;  %v146_v2 = vld [vmem:[%s219_s0 + $0x2] sm:$0x3] }
   0x2   :  { %v147_v3 = vld [vmem:[%s219_s0 + $0xa] sm:$0x3]  ;;  %v22_v4 = vmax.f32 %v17_v0, %v146_v2  ;;  %v148_v5 = vld [vmem:[%s219_s0 + $0x4] sm:$0x3]  ;;  %v149_v6 = vld [vmem:[%s219_s0 + $0xc] sm:$0x3] }
   0x3   :  { %v23_v7 = vmax.f32 %v18_v1, %v147_v3  ;;  %v150_v8 = vld [vmem:[%s219_s0 + $0x6] sm:$0x3]  ;;  %v151_v10 = vld [vmem:[%s219_s0 + $0xe] sm:$0x3] }
   0x4   :  { %v27_v9 = vmax.f32 %v22_v4, %v148_v5 }
   0x5   :  { %v28_v11 = vmax.f32 %v23_v7, %v149_v6 }
   0x6   :  { %v32_v12 = vmax.f32 %v27_v9, %v150_v8 }
   0x7   :  { %v33_v13 = vmax.f32 %v28_v11, %v151_v10 }
   0x8   :  { %v34_v14 = vsub.f32 %v17_v0, %v32_v12  ;;  %v46_v15 = vsub.f32 %v146_v2, %v32_v12  ;;  %v58_v16 = vsub.f32 %v148_v5, %v32_v12  ;;  %v70_v22 = vsub.f32 %v150_v8, %v32_v12 }
   0x9   :  { %v35_v17 = vsub.f32 %v18_v1, %v33_v13  ;;  %v47_v18 = vsub.f32 %v147_v3, %v33_v13  ;;  %v59_v19 = vsub.f32 %v149_v6, %v33_v13  ;;  %v71_v25 = vsub.f32 %v151_v10, %v33_v13 }
   0xa   :  { %v36_v20 = vmul.f32 1.442695, %v34_v14  ;;  %v48_v21 = vmul.f32 1.442695, %v46_v15  ;;  %v60_v26 = vmul.f32 1.442695, %v58_v16 }
   0xb   :  { %v38_v23 = vmul.f32 1.442695, %v35_v17  ;;  %v50_v24 = vmul.f32 1.442695, %v47_v18  ;;  %v62_v27 = vmul.f32 1.442695, %v59_v19 }
   0xc   :  { %152 = vpow2.f32 %v36_v20  ;;  %v72_v28 = vmul.f32 1.442695, %v70_v22  ;;  %v74_v29 = vmul.f32 1.442695, %v71_v25 }
   0xd   :  { %154 = vpow2.f32 %v38_v23 }
   0xe   :  { %156 = vpow2.f32 %v48_v21 }
   0xf   :  { %158 = vpow2.f32 %v50_v24 }
  0x10   :  { %160 = vpow2.f32 %v60_v26 }
  0x11   :  { %162 = vpow2.f32 %v62_v27 }
  0x12   :  { %v153_v30 = vpop.eup %152  ;;  %164 = vpow2.f32 %v72_v28 }
  0x13   :  { %v155_v31 = vpop.eup %154  ;;  %166 = vpow2.f32 %v74_v29  ;;  %v42_v44 = vmul.f32 %v153_v30, %v34_v14 }
  0x14   :  { %v157_v32 = vpop.eup %156  ;;  %v43_v46 = vmul.f32 %v155_v31, %v35_v17 }
  0x15   :  { %v159_v33 = vpop.eup %158  ;;  %v52_v34 = vadd.f32 %v157_v32, %v153_v30  ;;  %v54_v45 = vmul.f32 %v157_v32, %v46_v15 }
  0x16   :  { %v161_v35 = vpop.eup %160  ;;  %v53_v36 = vadd.f32 %v159_v33, %v155_v31  ;;  %v55_v47 = vmul.f32 %v159_v33, %v47_v18 }
  0x17   :  { %v163_v37 = vpop.eup %162  ;;  %v64_v38 = vadd.f32 %v161_v35, %v52_v34  ;;  %v56_v48 = vadd.f32 %v54_v45, %v42_v44  ;;  %v66_v49 = vmul.f32 %v161_v35, %v58_v16 }
  0x18   :  { %v165_v39 = vpop.eup %164  ;;  %v65_v40 = vadd.f32 %v163_v37, %v53_v36  ;;  %v57_v50 = vadd.f32 %v55_v47, %v43_v46  ;;  %v67_v51 = vmul.f32 %v163_v37, %v59_v19 }
  0x19   :  { %v167_v41 = vpop.eup %166  ;;  %v76_v42 = vadd.f32 %v165_v39, %v64_v38  ;;  %v68_v53 = vadd.f32 %v66_v49, %v56_v48  ;;  %v78_v56 = vmul.f32 %v165_v39, %v70_v22 }
  0x1a   :  { %v77_v43 = vadd.f32 %v167_v41, %v65_v40  ;;  %v69_v55 = vadd.f32 %v67_v51, %v57_v50  ;;  %v79_v58 = vmul.f32 %v167_v41, %v71_v25 }
  0x1b   :  { %168 = vrcp.f32 %v76_v42  ;;  %vm91_vm0 = vweird.f32 %v76_v42  ;;  %v97_v59 = vand.u32 2147483648, %v76_v42  ;;  %v95_v62 = vand.u32 2147483647, %v76_v42 }
  0x1c   :  { %170 = vrcp.f32 %v77_v43  ;;  %v112_v63 = vand.u32 2147483648, %v77_v43  ;;  %vm106_vm2 = vweird.f32 %v77_v43  ;;  %v110_v1 = vand.u32 2147483647, %v77_v43 }
  0x1d   :  { %172 = vlog2.f32 %v76_v42  ;;  %v98_v5 = vor.u32 1.1754944e-38, %v97_v59  ;;  %v80_v8 = vadd.f32 %v78_v56, %v68_v53  ;;  %vm96_vm5 = vcmp.eq.f32.partialorder %v95_v62, 8.507059e+37 }
  0x1e   :  { %174 = vlog2.f32 %v77_v43  ;;  %v113_v10 = vor.u32 1.1754944e-38, %v112_v63  ;;  %v81_v11 = vadd.f32 %v79_v58, %v69_v55  ;;  %vm111_vm7 = vcmp.eq.f32.partialorder %v110_v1, 8.507059e+37 }
  0x21   :  { %v169_v52 = vpop.eup %168 }
  0x22   :  { %v171_v54 = vpop.eup %170  ;;  %v87_v57 = vmul.f32 %v169_v52, %v76_v42  ;;  %vm92_vm1 = vweird.f32 %v169_v52 }
  0x23   :  { %v102_v60 = vmul.f32 %v171_v54, %v77_v43  ;;  %vm107_vm3 = vweird.f32 %v171_v54  ;;  %v173_v3 = vpop.eup %172  ;;  %vm210_vm4 = vmor %vm91_vm0, %vm92_vm1 }
  0x24   :  { %v88_v61 = vsub.f32 1.0, %v87_v57  ;;  %v175_v7 = vpop.eup %174  ;;  %vm108_vm6 = vmor %vm106_vm2, %vm107_vm3  ;;  %v83_v13 = vmul.f32 0.6931472, %v173_v3 }
  0x25   :  { %v103_v0 = vsub.f32 1.0, %v102_v60  ;;  %v85_v15 = vmul.f32 0.6931472, %v175_v7 }
  0x26   :  { %v89_v2 = vmul.f32 %v169_v52, %v88_v61 }
  0x27   :  { %v104_v6 = vmul.f32 %v171_v54, %v103_v0 }
  0x28   :  { %v90_v9 = vadd.f32 %v169_v52, %v89_v2 }
  0x29   :  { %v105_v12 = vadd.f32 %v171_v54, %v104_v6 }
  0x2a   :  { %v94_v14 = vsel %vm210_vm4, %v169_v52, %v90_v9 }
  0x2b   :  { %v99_v16 = vsel %vm96_vm5, %v98_v5, %v94_v14  ;;  %v109_v17 = vsel %vm108_vm6, %v171_v54, %v105_v12 }
  0x2c   :  { %v100_v18 = vmul.f32 %v99_v16, %v80_v8  ;;  %v114_v19 = vsel %vm111_vm7, %v113_v10, %v109_v17 }
  0x2d   :  { %v115_v20 = vmul.f32 %v114_v19, %v81_v11 }
  0x2e   :  { %v116_v21 = vsub.f32 %v83_v13, %v100_v18 }
  0x2f   :  { %v117_v22 = vsub.f32 %v85_v15, %v115_v20 }
  0x30   :  { %v119_v23 = vsel %vm118_vm8, %v116_v21, 0.0 }
  0x31   :  { %v120_v24 = vsel %vm118_vm8, %v117_v22, 0.0 }
  0x32   :  { %v121_v25 = vadd.f32 %v120_v24, %v119_v23 }
  0x34   :  { %v122_v26 = vrot.slane %v121_v25, 4 }
  0x36   :  { %v123_v27 = vadd.f32 %v122_v26, %v121_v25 }
  0x38   :  { %v124_v28 = vrot.slane %v123_v27, 2 }
  0x3a   :  { %v125_v29 = vadd.f32 %v124_v28, %v123_v27 }
  0x3c   :  { %v126_v30 = vrot.slane %v125_v29, 1 }
  0x3e   :  { %v127_v31 = vadd.f32 %v126_v30, %v125_v29 }
  0x40   :  { %128 = vst [vmem:[%s220_s1] sm:$0x1] %v127_v31 }

// kernel: entropy_loss.2
= control target key start
LH: loop header
LB: loop body
LE: loop exit
PB: predicated region body
PF: predicated region fallthrough
CT: control target
= control target key end

     0   :  { %vm42_vm0 = vcmask 519424   ;;  %vm124_vm1 = vcmask 1044224   ;;  %vm83_vm2 = vcmask 781824   ;;  %vm9_vm3 = vcmask 257024   ;;  %s212_s8 = smov 32   ;;  %s213_s9 = smov 64   ;;  %s290_s0 = inlined_call_operand.vmem [shape: f32[4,128], index: 0, kind: input, shape index: {}]   ;;  %s291_s1 = inlined_call_operand.vmem [shape: f32[1,1,128], index: 1, kind: output, shape index: {}]  }
   0x1   :  { %v8_v0 = vld [vmem:[%s290_s0] sm:$0xf]  ;;  %s211_s0 = smov 96  }
   0x2   :  { %v43_v1 = vsel %vm42_vm0, %v8_v0, -inf  ;;  %v125_v2 = vsel %vm124_vm1, %v8_v0, -inf  ;;  %v84_v3 = vsel %vm83_vm2, %v8_v0, -inf  ;;  %v10_v4 = vsel %vm9_vm3, %v8_v0, -inf }
   0x3   :  { %44 = vmax.xlane.f32.xlu0 %v43_v1  ;;  %126 = vmax.xlane.f32.xlu1 %v125_v2 }
   0xb   :  { %85 = vmax.xlane.f32.xlu0 %v84_v3  ;;  %11 = vmax.xlane.f32.xlu1 %v10_v4 }
  0x76   :  { %v45_v5 = vpop.xlane.xlu0 %44  ;;  %v127_v6 = vpop.xlane.xlu1 %126 }
  0x77   :  { %v46_v7 = vsub.f32 %v8_v0, %v45_v5  ;;  %v128_v8 = vsub.f32 %v8_v0, %v127_v6 }
  0x79   :  { %v47_v9 = vmul.f32 1.442695, %v46_v7  ;;  %v129_v10 = vmul.f32 1.442695, %v128_v8 }
  0x7b   :  { %187 = vpow2.f32 %v47_v9 }
  0x7c   :  { %189 = vpow2.f32 %v129_v10 }
  0x7e   :  { %v86_v11 = vpop.xlane.xlu0 %85  ;;  %v12_v20 = vpop.xlane.xlu1 %11 }
  0x7f   :  { %v87_v12 = vsub.f32 %v8_v0, %v86_v11  ;;  %v13_v21 = vsub.f32 %v8_v0, %v12_v20 }
  0x81   :  { %v188_v13 = vpop.eup %187  ;;  %v88_v14 = vmul.f32 1.442695, %v87_v12  ;;  %v14_v22 = vmul.f32 1.442695, %v13_v21 }
  0x82   :  { %v190_v15 = vpop.eup %189  ;;  %v56_v16 = vmul.f32 %v188_v13, %v46_v7  ;;  %50 = vrot.lane.b32.xlu2 %v188_v13, %s211_s0 }
  0x83   :  { %v138_v17 = vmul.f32 %v190_v15, %v128_v8  ;;  %191 = vpow2.f32 %v88_v14  ;;  %132 = vrot.lane.b32.xlu0 %v190_v15, %s212_s8 }
  0x84   :  { %58 = vrot.lane.b32.xlu1 %v56_v16, %s211_s0  ;;  %193 = vpow2.f32 %v14_v22 }
  0x89   :  { %v192_v18 = vpop.eup %191 }
  0x8a   :  { %v97_v19 = vmul.f32 %v192_v18, %v87_v12  ;;  %91 = vrot.lane.b32.xlu2 %v192_v18, %s213_s9  ;;  %v194_v23 = vpop.eup %193 }
  0x8b   :  { %v16_v24 = vsel %vm9_vm3, %v194_v23, 0.0  ;;  %v19_v27 = vmul.f32 %v194_v23, %v13_v21 }
  0x8d   :  { %v20_v30 = vsel %vm9_vm3, %v19_v27, 0.0 }
  0xb3   :  { %17 = vadd.xlane.f32.xlu2 %v16_v24 }
  0xcb   :  { %99 = vrot.lane.b32.xlu2 %v97_v19, %s213_s9 }
  0xd3   :  { %140 = vrot.lane.b32.xlu2 %v138_v17, %s212_s8 }
  0xdc   :  { %v51_v25 = vpop.permute.xlu2 %50 }
  0xdd   :  { %v53_v26 = vsel %vm9_vm3, %v51_v25, 0.0 }
  0xde   :  { %54 = vadd.xlane.f32.xlu0 %v53_v26 }
  0xe4   :  { %v92_v28 = vpop.permute.xlu2 %91 }
  0xe5   :  { %v94_v29 = vsel %vm9_vm3, %v92_v28, 0.0 }
  0xe6   :  { %95 = vadd.xlane.f32.xlu1 %v94_v29  ;;  %21 = vadd.xlane.f32.xlu0 %v20_v30 }
  0xf5   :  { %v133_v31 = vpop.permute.xlu0 %132 }
  0xf6   :  { %v135_v32 = vsel %vm9_vm3, %v133_v31, 0.0  ;;  %v59_v33 = vpop.permute.xlu1 %58 }
  0xf7   :  { %v61_v34 = vsel %vm9_vm3, %v59_v33, 0.0 }
  0xfc   :  { %136 = vadd.xlane.f32.xlu2 %v135_v32 }
 0x104   :  { %62 = vadd.xlane.f32.xlu2 %v61_v34 }
 0x126   :  { %v18_v35 = vpop.xlane.xlu2 %17 }
 0x127   :  { %v34_v57 = vand.u32 2147483647, %v18_v35  ;;  %v36_v58 = vand.u32 2147483648, %v18_v35  ;;  %vm30_vm8 = vweird.f32 %v18_v35 }
 0x129   :  { %vm263_vm12 = vcmp.eq.f32.partialorder %v34_v57, 8.507059e+37  ;;  %v37_v9 = vor.u32 1.1754944e-38, %v36_v58 }
 0x12e   :  { %v100_v36 = vpop.permute.xlu2 %99 }
 0x12f   :  { %v102_v37 = vsel %vm9_vm3, %v100_v36, 0.0 }
 0x130   :  { %103 = vadd.xlane.f32.xlu1 %v102_v37 }
 0x136   :  { %v141_v38 = vpop.permute.xlu2 %140 }
 0x137   :  { %v143_v39 = vsel %vm9_vm3, %v141_v38, 0.0 }
 0x138   :  { %144 = vadd.xlane.f32.xlu0 %v143_v39 }
 0x151   :  { %v55_v40 = vpop.xlane.xlu0 %54 }
 0x152   :  { %195 = vrcp.f32 %v55_v40  ;;  %v77_v62 = vand.u32 2147483648, %v55_v40  ;;  %vm71_vm6 = vweird.f32 %v55_v40  ;;  %v75_v63 = vand.u32 2147483647, %v55_v40 }
 0x153   :  { %197 = vrcp.f32 %v18_v35 }
 0x154   :  { %v78_v10 = vor.u32 1.1754944e-38, %v77_v62  ;;  %vm76_vm14 = vcmp.eq.f32.partialorder %v75_v63, 8.507059e+37 }
 0x158   :  { %v196_v42 = vpop.eup %195 }
 0x159   :  { %v96_v41 = vpop.xlane.xlu1 %95  ;;  %v236_v43 = vpop.eup %197  ;;  %v67_v46 = vmul.f32 %v196_v42, %v55_v40  ;;  %vm72_vm4 = vweird.f32 %v196_v42 }
 0x15a   :  { %199 = vrcp.f32 %v96_v41  ;;  %v26_v47 = vmul.f32 %v236_v43, %v18_v35  ;;  %vm31_vm5 = vweird.f32 %v236_v43  ;;  %vm249_vm9 = vmor %vm71_vm6, %vm72_vm4  ;;  %v118_v2 = vand.u32 2147483648, %v96_v41  ;;  %v22_v16 = vpop.xlane.xlu0 %21 }
 0x15b   :  { %v68_v49 = vsub.f32 1.0, %v67_v46  ;;  %vm253_vm10 = vmor %vm30_vm8, %vm31_vm5  ;;  %vm112_vm11 = vweird.f32 %v96_v41  ;;  %v116_v5 = vand.u32 2147483647, %v96_v41  ;;  %vm165_vm4 = vcmask 3072  }
 0x15c   :  { %v27_v51 = vsub.f32 1.0, %v26_v47  ;;  %v119_v18 = vor.u32 1.1754944e-38, %v118_v2 }
 0x15d   :  { %v69_v54 = vmul.f32 %v196_v42, %v68_v49  ;;  %vm117_vm1 = vcmp.eq.f32.partialorder %v116_v5, 8.507059e+37 }
 0x15e   :  { %v28_v55 = vmul.f32 %v236_v43, %v27_v51 }
 0x15f   :  { %v70_v59 = vadd.f32 %v196_v42, %v69_v54 }
 0x160   :  { %v200_v45 = vpop.eup %199  ;;  %v29_v61 = vadd.f32 %v236_v43, %v28_v55 }
 0x161   :  { %v108_v48 = vmul.f32 %v200_v45, %v96_v41  ;;  %vm113_vm7 = vweird.f32 %v200_v45  ;;  %v74_v4 = vsel %vm249_vm9, %v196_v42, %v70_v59 }
 0x162   :  { %v33_v7 = vsel %vm253_vm10, %v236_v43, %v29_v61  ;;  %vm268_vm13 = vmor %vm112_vm11, %vm113_vm7  ;;  %v79_v17 = vsel %vm76_vm14, %v78_v10, %v74_v4 }
 0x163   :  { %v109_v52 = vsub.f32 1.0, %v108_v48  ;;  %v38_v25 = vsel %vm263_vm12, %v37_v9, %v33_v7 }
 0x164   :  { %v39_v27 = vmul.f32 %v38_v25, %v22_v16 }
 0x165   :  { %v110_v56 = vmul.f32 %v200_v45, %v109_v52 }
 0x167   :  { %v111_v0 = vadd.f32 %v200_v45, %v110_v56 }
 0x169   :  { %v115_v14 = vsel %vm268_vm13, %v200_v45, %v111_v0 }
 0x16a   :  { %v120_v26 = vsel %vm117_vm1, %v119_v18, %v115_v14 }
 0x16f   :  { %v238_v44 = vpop.xlane.xlu2 %136 }
 0x170   :  { %201 = vrcp.f32 %v238_v44  ;;  %vm153_vm15 = vweird.f32 %v238_v44  ;;  %v159_v20 = vand.u32 2147483648, %v238_v44  ;;  %v157_v23 = vand.u32 2147483647, %v238_v44 }
 0x171   :  { %203 = vlog2.f32 %v18_v35 }
 0x172   :  { %205 = vlog2.f32 %v55_v40  ;;  %v160_v31 = vor.u32 1.1754944e-38, %v159_v20  ;;  %vm158_vm3 = vcmp.eq.f32.partialorder %v157_v23, 8.507059e+37 }
 0x173   :  { %207 = vlog2.f32 %v96_v41 }
 0x174   :  { %209 = vlog2.f32 %v238_v44 }
 0x176   :  { %v242_v50 = vpop.eup %201 }
 0x177   :  { %v149_v53 = vmul.f32 %v242_v50, %v238_v44  ;;  %v63_v11 = vpop.xlane.xlu2 %62  ;;  %v204_v13 = vpop.eup %203  ;;  %vm154_vm0 = vweird.f32 %v242_v50 }
 0x178   :  { %v206_v15 = vpop.eup %205  ;;  %v80_v21 = vmul.f32 %v79_v17, %v63_v11  ;;  %vm155_vm2 = vmor %vm153_vm15, %vm154_vm0  ;;  %v24_v30 = vmul.f32 0.6931472, %v204_v13 }
 0x179   :  { %v150_v60 = vsub.f32 1.0, %v149_v53  ;;  %v208_v24 = vpop.eup %207  ;;  %v65_v28 = vmul.f32 0.6931472, %v206_v15 }
 0x17a   :  { %v106_v33 = vmul.f32 0.6931472, %v208_v24  ;;  %v210_v35 = vpop.eup %209  ;;  %v40_v36 = vsub.f32 %v24_v30, %v39_v27 }
 0x17b   :  { %v151_v6 = vmul.f32 %v242_v50, %v150_v60  ;;  %v81_v32 = vsub.f32 %v65_v28, %v80_v21  ;;  %v147_v41 = vmul.f32 0.6931472, %v210_v35 }
 0x17d   :  { %v152_v22 = vadd.f32 %v242_v50, %v151_v6  ;;  %v82_v40 = vadd.f32 %v81_v32, %v40_v36 }
 0x17f   :  { %v156_v34 = vsel %vm155_vm2, %v242_v50, %v152_v22 }
 0x180   :  { %v161_v39 = vsel %vm158_vm3, %v160_v31, %v156_v34 }
 0x1a3   :  { %v104_v19 = vpop.xlane.xlu1 %103 }
 0x1a4   :  { %v121_v29 = vmul.f32 %v120_v26, %v104_v19 }
 0x1a6   :  { %v122_v37 = vsub.f32 %v106_v33, %v121_v29 }
 0x1a8   :  { %v123_v44 = vadd.f32 %v122_v37, %v82_v40 }
 0x1ab   :  { %v145_v38 = vpop.xlane.xlu0 %144 }
 0x1ac   :  { %v162_v42 = vmul.f32 %v161_v39, %v145_v38 }
 0x1ae   :  { %v163_v43 = vsub.f32 %v147_v41, %v162_v42 }
 0x1b0   :  { %v164_v45 = vadd.f32 %v163_v43, %v123_v44 }
 0x1b2   :  { %v166_v46 = vsel %vm165_vm4, %v164_v45, 0.0 }
 0x1b3   :  { %167 = vadd.xlane.f32.xlu2 %v166_v46 }
 0x226   :  { %v168_v47 = vpop.xlane.xlu2 %167 }
 0x227   :  { %v169_v48 = vrot.slane %v168_v47, 4 }
 0x229   :  { %v170_v49 = vadd.f32 %v169_v48, %v168_v47 }
 0x22b   :  { %v171_v51 = vrot.slane %v170_v49, 2 }
 0x22d   :  { %v172_v50 = vadd.f32 %v171_v51, %v170_v49 }
 0x22f   :  { %v173_v52 = vrot.slane %v172_v50, 1 }
 0x231   :  { %v174_v53 = vadd.f32 %v173_v52, %v172_v50 }
 0x233   :  { %182 = vpush %v174_v53 }
 0x264   :  { %s183_s10 = spop %182 }
 0x265   :  { %v176_v54 = vstv %s183_s10 }
 0x266   :  { %177 = vst [vmem:[%s291_s1] sm:$0x1] %v176_v54 }

</bundles_post_ra>
